<compile_context>
chip_gen: v5e
topology: v5e:2x2
jax: 0.10.0
libtpu: 0.0.40
codegen_flags: <defaults>
</compile_context>

<pallas_src>
import jax
import jax.numpy as jnp
from jax.experimental import pallas as pl
from jax.experimental.pallas import tpu as pltpu


_LANE = 128                               # fixed lane width (perf-neutral >=128)
_TARGET_BLOCK_BYTES = 8 * 1024 * 1024     # ~8 MiB blocks (good on v6e/v7x)
_MIN_SPLIT_BYTES = 1 * 1024 * 1024        # below this, a single block is fine
_VMEM_LIMIT_BYTES = 48 * 1024 * 1024      # explicit headroom; safe on v5e/v6e/v7x


def _copy_kernel(x_ref, o_ref):
    # identity copy of one tile — the only data movement
    o_ref[...] = x_ref[...]


def _compiler_params():
    return pltpu.CompilerParams(
        dimension_semantics=("parallel",),
        vmem_limit_bytes=_VMEM_LIMIT_BYTES,
    )


def _round_down_mult(v, m):
    """Round v down to a multiple of m, but never below m."""
    return max((v // m) * m, m)


def _copy_2d(flat, n, itemsize):
    """128-lane-aligned copy: view as (rows, 128) and block over rows."""
    rows = n // _LANE
    row_bytes = _LANE * itemsize
    x2d = flat.reshape(rows, _LANE)

    if rows * row_bytes <= _MIN_SPLIT_BYTES:
        # Small array: one block equal to the full extent (always legal).
        row_blk = rows
    else:
        # Big array: cap block at ~8 MiB AND guarantee >= 4 grid blocks so
        # DMAs pipeline and both v7x TensorCores get work. Multiple of 32 rows
        # keeps the block sublane-dense for every dtype (f32/bf16/int8/fp8).
        max_rows = _round_down_mult(_TARGET_BLOCK_BYTES // row_bytes, 32)
        quarter = _round_down_mult(pl.cdiv(rows, 4), 32)
        row_blk = min(max_rows, quarter)

    grid = (pl.cdiv(rows, row_blk),)

    out2d = pl.pallas_call(
        _copy_kernel,
        out_shape=jax.ShapeDtypeStruct((rows, _LANE), flat.dtype),
        grid_spec=pltpu.PrefetchScalarGridSpec(
            num_scalar_prefetch=0,
            grid=grid,
            in_specs=[pl.BlockSpec((row_blk, _LANE), lambda i: (i, 0))],
            out_specs=pl.BlockSpec((row_blk, _LANE), lambda i: (i, 0)),
        ),
        compiler_params=_compiler_params(),
        cost_estimate=pl.CostEstimate(
            flops=0, transcendentals=0, bytes_accessed=2 * n * itemsize,
        ),
    )(x2d)
    return out2d.reshape(-1)


def _copy_1d(flat, n, itemsize):
    """Ragged (n % 128 != 0) copy: 1-D blocks, last block masked by Pallas.

    No external pad/slice — exactly 2N bytes of HBM traffic.
    """
    if n * itemsize <= _MIN_SPLIT_BYTES:
        blk = n                               # full extent — always legal
    else:
        max_blk = _round_down_mult(_TARGET_BLOCK_BYTES // itemsize, 8 * _LANE)
        quarter = _round_down_mult(pl.cdiv(n, 4), 8 * _LANE)
        blk = min(max_blk, quarter)           # multiple of 1024 elements

    grid = (pl.cdiv(n, blk),)

    return pl.pallas_call(
        _copy_kernel,
        out_shape=jax.ShapeDtypeStruct((n,), flat.dtype),
        grid_spec=pltpu.PrefetchScalarGridSpec(
            num_scalar_prefetch=0,
            grid=grid,
            in_specs=[pl.BlockSpec((blk,), lambda i: (i,))],
            out_specs=pl.BlockSpec((blk,), lambda i: (i,)),
        ),
        compiler_params=_compiler_params(),
        cost_estimate=pl.CostEstimate(
            flops=0, transcendentals=0, bytes_accessed=2 * n * itemsize,
        ),
    )(flat)


def _pallas_materializing_copy(flat):
    """Copy a 1-D array through a Pallas kernel (layout-preserving, 2N bytes)."""
    n = flat.shape[0]
    if n == 0:
        return flat
    itemsize = jnp.dtype(flat.dtype).itemsize
    if n % _LANE == 0:
        return _copy_2d(flat, n, itemsize)
    return _copy_1d(flat, n, itemsize)


class Reshape:
    """JAX/Pallas equivalent of the PyTorch Reshape module."""

    def __init__(self, shape):
        self.shape = tuple(shape)

    def __repr__(self):
        return "Reshape(shape={})".format(self.shape)

    def __call__(self, x, materialize=False):
        if not materialize:
            # Highest-value optimization: reshape is metadata-only in XLA.
            return x.reshape(self.shape)
        # Opt-in materializing copy through a Pallas kernel.
        flat = x.reshape(-1)
        return _pallas_materializing_copy(flat).reshape(self.shape)


if __name__ == "__main__":
    key = jax.random.PRNGKey(0)

    # small NCHW input: batch=2, channels=4, spatial=16x16
    x = jax.random.normal(key, (2, 4, 16, 16), dtype=jnp.float32)
    target_shape = (2, 4 * 16 * 16)
    layer = Reshape(target_shape)
    ref = x.reshape(target_shape)

    # 1) default (free, metadata-only) path
    y_fast = layer(x)
    jax.block_until_ready(y_fast)
    assert y_fast.shape == target_shape and y_fast.dtype == x.dtype
    assert jnp.array_equal(y_fast, ref), "metadata reshape mismatch"

    # 2) Pallas materializing-copy path (exercises the 2-D aligned kernel)
    y_copy = layer(x, materialize=True)
    jax.block_until_ready(y_copy)
    assert y_copy.shape == target_shape and y_copy.dtype == x.dtype
    assert jnp.array_equal(y_copy, ref), "Pallas reshape output mismatch"

    # 3) odd-sized input exercises the ragged 1-D kernel path (no pad/slice)
    x_odd = jax.random.normal(jax.random.PRNGKey(1), (3, 5, 7), dtype=jnp.float32)
    layer_odd = Reshape((105,))
    y_odd = layer_odd(x_odd, materialize=True)
    jax.block_until_ready(y_odd)
    assert jnp.array_equal(y_odd, x_odd.reshape(105)), "ragged-tail reshape mismatch"

    # 4) larger aligned input exercises the multi-block (>=4 grid steps) path
    x_big = jax.random.normal(jax.random.PRNGKey(2), (8, 64, 32, 32), dtype=jnp.float32)
    layer_big = Reshape((8, 64 * 32 * 32))
    y_big = layer_big(x_big, materialize=True)
    jax.block_until_ready(y_big)
    assert jnp.array_equal(y_big, x_big.reshape(8, 64 * 32 * 32)), "multi-block mismatch"

    print("KERNEL_OK")
</pallas_src>

<mosaic_0001>
module attributes {stable_mosaic.version = 11 : i64} {
  func.func @_copy_kernel(%arg0: i32, %arg1: memref<16x128xf32, #tpu.memory_space<vmem>>, %arg2: memref<16x128xf32, #tpu.memory_space<vmem>>) attributes {dimension_semantics = [#tpu.dimension_semantics<parallel>], iteration_bounds = array<i64: 1>, scalar_prefetch = 0 : i64, scratch_operands = 0 : i64, tpu.core_type = #tpu.core_type<tc>, window_params = [{transform_indices = @transform_0, window_bounds = array<i64: 16, 128>}, {transform_indices = @transform_1, window_bounds = array<i64: 16, 128>}]} {
    %c0 = arith.constant 0 : index
    %c0_0 = arith.constant 0 : index
    %0 = vector.load %arg1[%c0, %c0_0] : memref<16x128xf32, #tpu.memory_space<vmem>>, vector<16x128xf32>
    %c0_1 = arith.constant 0 : index
    %c0_2 = arith.constant 0 : index
    %1 = vector.load %arg2[%c0_1, %c0_2] : memref<16x128xf32, #tpu.memory_space<vmem>>, vector<16x128xf32>
    tpu.vector_store %arg2[%c0_1, %c0_2], %0 {strides = array<i32>} : memref<16x128xf32, #tpu.memory_space<vmem>>, vector<16x128xf32>,
    return
  }
  func.func @transform_0(%arg0: i32) -> (i32, i32) {
    %c0_i32 = arith.constant 0 : i32
    %c0_i32_0 = arith.constant 0 : i32
    return %arg0, %c0_i32 : i32, i32
  }
  func.func @transform_1(%arg0: i32) -> (i32, i32) {
    %c0_i32 = arith.constant 0 : i32
    %c0_i32_0 = arith.constant 0 : i32
    return %arg0, %c0_i32 : i32, i32
  }
}

</mosaic_0001>

<bundles_post_ra>
// kernel: tpu_custom_call.1
= control target key start
LH: loop header
LB: loop body
LE: loop exit
PB: predicated region body
PF: predicated region fallthrough
CT: control target
= control target key end

     0   :  { %6 = vsyncpa [#allocation3], 0  ;;  %s124_s0 = inlined_call_operand.hbm [shape: f32[16,128], index: 0, kind: input, shape index: {}]   ;;  %s125_s1 = inlined_call_operand.hbm [shape: f32[16,128], index: 1, kind: output, shape index: {}]  }
   0x1   :  { %7 = vsyncpa [#allocation4], 0  ;;  %s12_s8 = sshll.u32 %s124_s0, 4  ;;  %s104_s9 = smov [#allocation2]   ;;  %s13_s8 = int_to_ptr.hbm [resolvable:$true] %s12_s8 }
   0x2   :  { %s14_s10 = sshll.u32 %s104_s9, 4  ;;  %s105_s11 = smov 128   ;;  %s15_s10 = int_to_ptr.vmem [resolvable:$true] %s14_s10 }
   0x3   :  { %s106_s12 = smov 8  }
   0x4   :  { %20 = dma.hbm_to_vmem [thread:$0]  %s13_s8, 256, %s15_s10, [#allocation3], %s105_s11, %s105_s11, %s106_s12  }
   0x5   :  { %100 = dma.done.wait [#allocation3], 256  }
   0x6   :  { %101 = vsyncadd [#allocation3], 4294967040  ;;  %s107_s13 = smov [#allocation5]   ;;  %s35_s17 = sshll.u32 %s125_s1, 4  ;;  %v25_v0 = vld [vmem:[#allocation2] sm:$0xff]  ;;  %v26_v1 = vld [vmem:[#allocation2 + $0x8] sm:$0xff]  ;;  %s36_s17 = int_to_ptr.hbm [resolvable:$true] %s35_s17 }
   0x7   :  { %s33_s14 = sshll.u32 %s107_s13, 4  ;;  %27 = vst [vmem:[#allocation5] sm:$0xff] %v25_v0  ;;  %s34_s14 = int_to_ptr.vmem [resolvable:$true] %s33_s14 }
   0x8   :  { %28 = vst [vmem:[#allocation5 + $0x8] sm:$0xff] %v26_v1 }
   0x9   :  { %41 = dma.vmem_to_hbm [thread:$0]  %s34_s14, 256, %s36_s17, [#allocation4], %s105_s11, %s105_s11, %s106_s12  }
   0xa   :  { %102 = dma.done.wait [#allocation4], 256  }
   0xb   :  { %103 = vsyncadd [#allocation4], 4294967040 }
   0xc   :  { %46 = vsyncpa [#allocation3], 1 }
   0xd   :  { %47 = vsyncpa [#allocation4], 1 }

</bundles_post_ra>
